<compile_context>
chip_gen: v6e
topology: v6e:2x2x1
jax: 0.10.0
libtpu: 0.0.40
codegen_flags: <defaults>
</compile_context>

<pallas_src>
import math

import jax
import jax.numpy as jnp
from jax import lax
from jax.experimental import pallas as pl
from jax.experimental.pallas import tpu as pltpu

_LN_EPS = 1e-5
_INV_SQRT2 = 1.0 / math.sqrt(2.0)
_LANE = 128
_ROW_ALIGN = 16                      # bf16 activations pack 16 sublanes / vreg
_VMEM_CAP = 56 * 1024 * 1024         # headroom under v7x's 64 MiB physical VMEM
_VMEM_FLOOR = 32 * 1024 * 1024


def _round_up(n, m):
    return ((n + m - 1) // m) * m


# ---------------------------------------------------------------------------
# Fused kernel builder (closure over the static layer structure)
# ---------------------------------------------------------------------------
def _build_kernel(layers, concepts_idx):
    """layers: tuple of (kind, real_out) with kind in {"ln_gelu", "linear"}."""
    n_params = sum(4 if kind == "ln_gelu" else 2 for kind, _ in layers)

    def kernel(*refs):
        x_ref = refs[0]
        param_refs = refs[1:1 + n_params]
        concepts_ref = refs[1 + n_params]
        final_ref = refs[2 + n_params]

        h = x_ref[...]                                  # f32 (TB, in_pad)
        idx = 0
        for li, (kind, real_out) in enumerate(layers):
            if kind == "ln_gelu":
                w_ref, b_ref, g_ref, beta_ref = param_refs[idx:idx + 4]
                idx += 4
                y = jnp.dot(h.astype(w_ref.dtype), w_ref[...],
                            preferred_element_type=jnp.float32) + b_ref[...]
                # Padded lanes of y are exactly 0 (padded weight cols & bias = 0),
                # so plain sums over the padded width give real-column statistics.
                inv_n = jnp.float32(1.0 / real_out)
                mean = jnp.sum(y, axis=-1, keepdims=True) * inv_n
                ex2 = jnp.sum(y * y, axis=-1, keepdims=True) * inv_n
                var = jnp.maximum(ex2 - mean * mean, 0.0)   # biased (nn.LayerNorm)
                y_ln = ((y - mean) * lax.rsqrt(var + _LN_EPS)
                        * g_ref[...] + beta_ref[...])
                # Exact erf GELU (nn.GELU() default). gamma/beta padded with 0
                # => padded lanes remain exactly 0 after LN affine and GELU.
                h = 0.5 * y_ln * (1.0 + lax.erf(y_ln * _INV_SQRT2))
                # TODO(synk): training-mode Dropout(0.5) masking not implemented;
                # eval/inference semantics (identity) assumed.
            else:  # plain affine output layer
                w_ref, b_ref = param_refs[idx:idx + 2]
                idx += 2
                h = jnp.dot(h.astype(w_ref.dtype), w_ref[...],
                            preferred_element_type=jnp.float32) + b_ref[...]
            if li == concepts_idx:
                concepts_ref[...] = h
        final_ref[...] = h

    return kernel, n_params


# ---------------------------------------------------------------------------
# Model flattening + lane-dense (128) padding of parameters (one-time prepare)
# ---------------------------------------------------------------------------
def _flatten_model(params):
    layers, flat = [], []

    def add_ffn(p):
        for (w, b, g, be) in p["blocks"]:
            layers.append(("ln_gelu", int(w.shape[1])))
            flat.append((w, b, g, be))
        w_out, b_out = p["out"]
        layers.append(("linear", int(w_out.shape[1])))
        flat.append((w_out, b_out))

    add_ffn(params["concept"])
    concepts_idx = len(layers) - 1
    fp = params["final"]
    if "linear_only" in fp:
        w, b = fp["linear_only"]
        layers.append(("linear", int(w.shape[1])))
        flat.append((w, b))
    else:
        add_ffn(fp)
    return tuple(layers), flat, concepts_idx


def _pad_params(layers, flat, weight_dtype):
    padded = []
    for (kind, _), p in zip(layers, flat):
        w, b = p[0], p[1]
        in_p = _round_up(w.shape[0], _LANE)
        out_p = _round_up(w.shape[1], _LANE)
        w_p = jnp.pad(w, ((0, in_p - w.shape[0]),
                          (0, out_p - w.shape[1]))).astype(weight_dtype)
        b_p = jnp.pad(b, (0, out_p - b.shape[0])).reshape(1, out_p).astype(jnp.float32)
        if kind == "ln_gelu":
            g, be = p[2], p[3]
            # gamma padded with 0.0 so padded lanes stay exactly 0 through LN.
            g_p = jnp.pad(g, (0, out_p - g.shape[0])).reshape(1, out_p).astype(jnp.float32)
            be_p = jnp.pad(be, (0, out_p - be.shape[0])).reshape(1, out_p).astype(jnp.float32)
            padded.extend([w_p, b_p, g_p, be_p])
        else:
            padded.extend([w_p, b_p])
    return tuple(padded)


def prepare_concept_bottleneck(params, weight_dtype=jnp.bfloat16):
    """One-time prepare step (call OUTSIDE the per-step forward): flatten,
    zero-pad to 128 lanes and cast weights to the MXU dtype."""
    layers, flat, concepts_idx = _flatten_model(params)
    padded = _pad_params(layers, flat, weight_dtype)
    in_dim = int(flat[0][0].shape[0])
    return {"layers": layers, "concepts_idx": concepts_idx,
            "in_dim": in_dim, "padded": padded}


# ---------------------------------------------------------------------------
# VMEM budget estimate (sets vmem_limit_bytes / caps the batch block)
# ---------------------------------------------------------------------------
def _vmem_bytes(padded_params, tb, in_pad, c_pad, f_pad, layers):
    param_bytes = sum(int(math.prod(p.shape)) * p.dtype.itemsize
                      for p in padded_params)
    widths = [in_pad] + [_round_up(w, _LANE) for _, w in layers]
    max_w = max(widths)
    io_bytes = tb * (in_pad + c_pad + f_pad) * 4          # f32 in/out blocks
    live_f32 = 6 * tb * max_w * 4                         # in-flight f32 temporaries
    # 2x: conservative double-buffering allowance for auto-pipelined blocks.
    return 2 * (param_bytes + io_bytes) + live_f32


# ---------------------------------------------------------------------------
# Forward: single fused pallas_call, gridded over the batch
# ---------------------------------------------------------------------------
def make_forward(prepared, max_batch_block=256):
    layers = prepared["layers"]
    concepts_idx = prepared["concepts_idx"]
    in_dim = prepared["in_dim"]
    kernel, n_params = _build_kernel(layers, concepts_idx)

    concept_out = layers[concepts_idx][1]
    final_out = layers[-1][1]
    in_pad = _round_up(in_dim, _LANE)
    c_pad = _round_up(concept_out, _LANE)
    f_pad = _round_up(final_out, _LANE)

    def forward(padded_params, x):
        assert x.shape[1] == in_dim
        B = x.shape[0]

        # Batch block: lane-dense rows (multiple of 16 for bf16 packing), capped
        # by max_batch_block and shrunk until the working set fits the VMEM cap.
        tb = min(_round_up(B, _ROW_ALIGN), _round_up(max_batch_block, _ROW_ALIGN))
        while tb > _ROW_ALIGN and _vmem_bytes(padded_params, tb, in_pad, c_pad,
                                              f_pad, layers) > _VMEM_CAP:
            tb = max(_ROW_ALIGN, (tb // 2 // _ROW_ALIGN) * _ROW_ALIGN)

        b_pad = _round_up(B, tb)
        x_pad = jnp.pad(x.astype(jnp.float32),
                        ((0, b_pad - B), (0, in_pad - in_dim)))
        grid = (b_pad // tb,)

        est = _vmem_bytes(padded_params, tb, in_pad, c_pad, f_pad, layers)
        vmem_limit = int(min(max(est, _VMEM_FLOOR), _VMEM_CAP))

        in_specs = [pl.BlockSpec((tb, in_pad), lambda i: (i, 0))]
        # Weights / biases: full-extent blocks with constant index_map
        # => VMEM-resident across all batch steps (no re-DMA per step).
        in_specs += [pl.BlockSpec(p.shape, lambda i: (0, 0)) for p in padded_params]
        out_specs = (pl.BlockSpec((tb, c_pad), lambda i: (i, 0)),
                     pl.BlockSpec((tb, f_pad), lambda i: (i, 0)))

        concepts_p, final_p = pl.pallas_call(
            kernel,
            grid=grid,
            out_shape=(jax.ShapeDtypeStruct((b_pad, c_pad), jnp.float32),
                       jax.ShapeDtypeStruct((b_pad, f_pad), jnp.float32)),
            in_specs=in_specs,
            out_specs=out_specs,
            compiler_params=pltpu.CompilerParams(
                dimension_semantics=("parallel",),
                vmem_limit_bytes=vmem_limit),
        )(x_pad, *padded_params)

        return concepts_p[:B, :concept_out], final_p[:B, :final_out]

    return forward


# ---------------------------------------------------------------------------
# Parameter construction (deterministic, torch.nn.Linear-style uniform init)
# ---------------------------------------------------------------------------
def _init_linear(key, in_dim, out_dim):
    kw, kb = jax.random.split(key)
    bound = 1.0 / math.sqrt(in_dim)
    w = jax.random.uniform(kw, (in_dim, out_dim), jnp.float32, -bound, bound)
    b = jax.random.uniform(kb, (out_dim,), jnp.float32, -bound, bound)
    return w, b


def init_ffn(key, input_size, hidden_sizes, output_size):
    sizes = [input_size] + list(hidden_sizes)
    keys = jax.random.split(key, len(hidden_sizes) + 1)
    blocks = []
    for i in range(len(hidden_sizes)):
        w, b = _init_linear(keys[i], sizes[i], sizes[i + 1])
        gamma = jnp.ones((sizes[i + 1],), jnp.float32)
        beta = jnp.zeros((sizes[i + 1],), jnp.float32)
        blocks.append((w, b, gamma, beta))
    w_out, b_out = _init_linear(keys[-1], hidden_sizes[-1], output_size)
    return {"blocks": blocks, "out": (w_out, b_out)}


def init_concept_bottleneck(key, input_size, concept_hidden_sizes,
                            concept_output_size, final_hidden_sizes,
                            final_output_size):
    k1, k2 = jax.random.split(key)
    concept_params = init_ffn(k1, input_size, concept_hidden_sizes,
                              concept_output_size)
    if not final_hidden_sizes:
        w, b = _init_linear(k2, concept_output_size, final_output_size)
        final_params = {"linear_only": (w, b)}
    else:
        final_params = init_ffn(k2, concept_output_size, final_hidden_sizes,
                                final_output_size)
    return {"concept": concept_params, "final": final_params}


# ---------------------------------------------------------------------------
# Pure-JAX reference (eval-mode semantics) for a correctness self-check
# ---------------------------------------------------------------------------
def _reference_forward(params, x):
    def ln(y, g, b):
        mean = jnp.mean(y, axis=-1, keepdims=True)
        var = jnp.mean((y - mean) ** 2, axis=-1, keepdims=True)
        return (y - mean) / jnp.sqrt(var + _LN_EPS) * g + b

    def gelu(y):
        return 0.5 * y * (1.0 + lax.erf(y * _INV_SQRT2))

    def ffn(p, h):
        for (w, b, g, be) in p["blocks"]:
            h = gelu(ln(jnp.dot(h, w, precision=lax.Precision.HIGHEST) + b, g, be))
        w, b = p["out"]
        return jnp.dot(h, w, precision=lax.Precision.HIGHEST) + b

    concepts = ffn(params["concept"], x)
    fp = params["final"]
    if "linear_only" in fp:
        w, b = fp["linear_only"]
        out = jnp.dot(concepts, w, precision=lax.Precision.HIGHEST) + b
    else:
        out = ffn(fp, concepts)
    return concepts, out


# ---------------------------------------------------------------------------
if __name__ == "__main__":
    batch = 8
    input_size = 16
    concept_hidden_sizes = [32, 32]
    concept_output_size = 8
    final_hidden_sizes = [16]
    final_output_size = 4

    key = jax.random.PRNGKey(0)
    k_params, k_x = jax.random.split(key)

    params = init_concept_bottleneck(
        k_params, input_size, concept_hidden_sizes, concept_output_size,
        final_hidden_sizes, final_output_size)

    x = jax.random.normal(k_x, (batch, input_size), jnp.float32)

    prepared = prepare_concept_bottleneck(params)      # one-time pad/cast step
    fwd = jax.jit(make_forward(prepared))
    concepts, final_output = fwd(prepared["padded"], x)
    jax.block_until_ready((concepts, final_output))

    assert concepts.shape == (batch, concept_output_size)
    assert final_output.shape == (batch, final_output_size)

    ref_c, ref_f = _reference_forward(params, x)
    # bf16 MXU operands => compare against the f32 reference at bf16-level tolerance.
    assert jnp.allclose(concepts, ref_c, atol=3e-2, rtol=3e-2), \
        float(jnp.max(jnp.abs(concepts - ref_c)))
    assert jnp.allclose(final_output, ref_f, atol=3e-2, rtol=3e-2), \
        float(jnp.max(jnp.abs(final_output - ref_f)))

    print("KERNEL_OK")
</pallas_src>

<mosaic_0001>
module attributes {stable_mosaic.version = 11 : i64} {
  func.func @kernel(%arg0: i32, %arg1: memref<16x128xf32, #tpu.memory_space<vmem>>, %arg2: memref<128x128xbf16, #tpu.memory_space<vmem>>, %arg3: memref<1x128xf32, #tpu.memory_space<vmem>>, %arg4: memref<1x128xf32, #tpu.memory_space<vmem>>, %arg5: memref<1x128xf32, #tpu.memory_space<vmem>>, %arg6: memref<128x128xbf16, #tpu.memory_space<vmem>>, %arg7: memref<1x128xf32, #tpu.memory_space<vmem>>, %arg8: memref<1x128xf32, #tpu.memory_space<vmem>>, %arg9: memref<1x128xf32, #tpu.memory_space<vmem>>, %arg10: memref<128x128xbf16, #tpu.memory_space<vmem>>, %arg11: memref<1x128xf32, #tpu.memory_space<vmem>>, %arg12: memref<128x128xbf16, #tpu.memory_space<vmem>>, %arg13: memref<1x128xf32, #tpu.memory_space<vmem>>, %arg14: memref<1x128xf32, #tpu.memory_space<vmem>>, %arg15: memref<1x128xf32, #tpu.memory_space<vmem>>, %arg16: memref<128x128xbf16, #tpu.memory_space<vmem>>, %arg17: memref<1x128xf32, #tpu.memory_space<vmem>>, %arg18: memref<16x128xf32, #tpu.memory_space<vmem>>, %arg19: memref<16x128xf32, #tpu.memory_space<vmem>>) attributes {dimension_semantics = [#tpu.dimension_semantics<parallel>], iteration_bounds = array<i64: 1>, scalar_prefetch = 0 : i64, scratch_operands = 0 : i64, tpu.core_type = #tpu.core_type<tc>, window_params = [{transform_indices = @transform_0, window_bounds = array<i64: 16, 128>}, {pipeline_mode = #tpu.pipeline_mode<synchronous>, transform_indices = @transform_1, window_bounds = array<i64: 128, 128>}, {pipeline_mode = #tpu.pipeline_mode<synchronous>, transform_indices = @transform_2, window_bounds = array<i64: 1, 128>}, {pipeline_mode = #tpu.pipeline_mode<synchronous>, transform_indices = @transform_3, window_bounds = array<i64: 1, 128>}, {pipeline_mode = #tpu.pipeline_mode<synchronous>, transform_indices = @transform_4, window_bounds = array<i64: 1, 128>}, {pipeline_mode = #tpu.pipeline_mode<synchronous>, transform_indices = @transform_5, window_bounds = array<i64: 128, 128>}, {pipeline_mode = #tpu.pipeline_mode<synchronous>, transform_indices = @transform_6, window_bounds = array<i64: 1, 128>}, {pipeline_mode = #tpu.pipeline_mode<synchronous>, transform_indices = @transform_7, window_bounds = array<i64: 1, 128>}, {pipeline_mode = #tpu.pipeline_mode<synchronous>, transform_indices = @transform_8, window_bounds = array<i64: 1, 128>}, {pipeline_mode = #tpu.pipeline_mode<synchronous>, transform_indices = @transform_9, window_bounds = array<i64: 128, 128>}, {pipeline_mode = #tpu.pipeline_mode<synchronous>, transform_indices = @transform_10, window_bounds = array<i64: 1, 128>}, {pipeline_mode = #tpu.pipeline_mode<synchronous>, transform_indices = @transform_11, window_bounds = array<i64: 128, 128>}, {pipeline_mode = #tpu.pipeline_mode<synchronous>, transform_indices = @transform_12, window_bounds = array<i64: 1, 128>}, {pipeline_mode = #tpu.pipeline_mode<synchronous>, transform_indices = @transform_13, window_bounds = array<i64: 1, 128>}, {pipeline_mode = #tpu.pipeline_mode<synchronous>, transform_indices = @transform_14, window_bounds = array<i64: 1, 128>}, {pipeline_mode = #tpu.pipeline_mode<synchronous>, transform_indices = @transform_15, window_bounds = array<i64: 128, 128>}, {pipeline_mode = #tpu.pipeline_mode<synchronous>, transform_indices = @transform_16, window_bounds = array<i64: 1, 128>}, {transform_indices = @transform_17, window_bounds = array<i64: 16, 128>}, {transform_indices = @transform_18, window_bounds = array<i64: 16, 128>}]} {
    %c0 = arith.constant 0 : index
    %c0_0 = arith.constant 0 : index
    %0 = vector.load %arg1[%c0, %c0_0] : memref<16x128xf32, #tpu.memory_space<vmem>>, vector<16x128xf32>
    %1 = arith.truncf %0 : vector<16x128xf32> to vector<16x128xbf16>
    %c0_1 = arith.constant 0 : index
    %c0_2 = arith.constant 0 : index
    %2 = vector.load %arg2[%c0_1, %c0_2] : memref<128x128xbf16, #tpu.memory_space<vmem>>, vector<128x128xbf16>
    %cst = arith.constant dense<0.000000e+00> : vector<16x128xf32>
    %3 = tpu.matmul %1, %2, %cst {dimension_numbers = #tpu.dot_dimension_numbers<[1], [0], [0], [1], [0, 0, 1, 1], [], []>} : vector<16x128xbf16>, vector<128x128xbf16>, vector<16x128xf32> -> vector<16x128xf32>
    %c0_3 = arith.constant 0 : index
    %c0_4 = arith.constant 0 : index
    %4 = vector.load %arg3[%c0_3, %c0_4] : memref<1x128xf32, #tpu.memory_space<vmem>>, vector<1x128xf32>
    %5 = vector.broadcast %4 : vector<1x128xf32> to vector<16x128xf32>
    %6 = arith.addf %3, %5 : vector<16x128xf32>
    %cst_5 = arith.constant dense<0.000000e+00> : vector<16xf32>
    %7 = vector.multi_reduction <add>, %6, %cst_5 [1] : vector<16x128xf32> to vector<16xf32>
    %8 = vector.shape_cast %7 : vector<16xf32> to vector<16x1xf32>
    %cst_6 = arith.constant 3.125000e-02 : f32
    %9 = vector.broadcast %cst_6 : f32 to vector<16x1xf32>
    %10 = arith.mulf %8, %9 : vector<16x1xf32>
    %11 = arith.mulf %6, %6 : vector<16x128xf32>
    %cst_7 = arith.constant dense<0.000000e+00> : vector<16xf32>
    %12 = vector.multi_reduction <add>, %11, %cst_7 [1] : vector<16x128xf32> to vector<16xf32>
    %13 = vector.shape_cast %12 : vector<16xf32> to vector<16x1xf32>
    %cst_8 = arith.constant 3.125000e-02 : f32
    %14 = vector.broadcast %cst_8 : f32 to vector<16x1xf32>
    %15 = arith.mulf %13, %14 : vector<16x1xf32>
    %16 = arith.mulf %10, %10 : vector<16x1xf32>
    %17 = arith.subf %15, %16 : vector<16x1xf32>
    %cst_9 = arith.constant 0.000000e+00 : f32
    %18 = vector.broadcast %cst_9 : f32 to vector<16x1xf32>
    %19 = arith.maximumf %17, %18 : vector<16x1xf32>
    %20 = vector.broadcast %10 : vector<16x1xf32> to vector<16x128xf32>
    %21 = arith.subf %6, %20 : vector<16x128xf32>
    %cst_10 = arith.constant 9.99999974E-6 : f32
    %22 = vector.broadcast %cst_10 : f32 to vector<16x1xf32>
    %23 = arith.addf %19, %22 : vector<16x1xf32>
    %24 = math.rsqrt %23 : vector<16x1xf32>
    %25 = vector.broadcast %24 : vector<16x1xf32> to vector<16x128xf32>
    %26 = arith.mulf %21, %25 : vector<16x128xf32>
    %c0_11 = arith.constant 0 : index
    %c0_12 = arith.constant 0 : index
    %27 = vector.load %arg4[%c0_11, %c0_12] : memref<1x128xf32, #tpu.memory_space<vmem>>, vector<1x128xf32>
    %28 = vector.broadcast %27 : vector<1x128xf32> to vector<16x128xf32>
    %29 = arith.mulf %26, %28 : vector<16x128xf32>
    %c0_13 = arith.constant 0 : index
    %c0_14 = arith.constant 0 : index
    %30 = vector.load %arg5[%c0_13, %c0_14] : memref<1x128xf32, #tpu.memory_space<vmem>>, vector<1x128xf32>
    %31 = vector.broadcast %30 : vector<1x128xf32> to vector<16x128xf32>
    %32 = arith.addf %29, %31 : vector<16x128xf32>
    %cst_15 = arith.constant 5.000000e-01 : f32
    %33 = vector.broadcast %cst_15 : f32 to vector<16x128xf32>
    %34 = arith.mulf %33, %32 : vector<16x128xf32>
    %cst_16 = arith.constant 0.707106769 : f32
    %35 = vector.broadcast %cst_16 : f32 to vector<16x128xf32>
    %36 = arith.mulf %32, %35 : vector<16x128xf32>
    %37 = math.erf %36 : vector<16x128xf32>
    %cst_17 = arith.constant 1.000000e+00 : f32
    %38 = vector.broadcast %cst_17 : f32 to vector<16x128xf32>
    %39 = arith.addf %38, %37 : vector<16x128xf32>
    %40 = arith.mulf %34, %39 : vector<16x128xf32>
    %41 = arith.truncf %40 : vector<16x128xf32> to vector<16x128xbf16>
    %c0_18 = arith.constant 0 : index
    %c0_19 = arith.constant 0 : index
    %42 = vector.load %arg6[%c0_18, %c0_19] : memref<128x128xbf16, #tpu.memory_space<vmem>>, vector<128x128xbf16>
    %cst_20 = arith.constant dense<0.000000e+00> : vector<16x128xf32>
    %43 = tpu.matmul %41, %42, %cst_20 {dimension_numbers = #tpu.dot_dimension_numbers<[1], [0], [0], [1], [0, 0, 1, 1], [], []>} : vector<16x128xbf16>, vector<128x128xbf16>, vector<16x128xf32> -> vector<16x128xf32>
    %c0_21 = arith.constant 0 : index
    %c0_22 = arith.constant 0 : index
    %44 = vector.load %arg7[%c0_21, %c0_22] : memref<1x128xf32, #tpu.memory_space<vmem>>, vector<1x128xf32>
    %45 = vector.broadcast %44 : vector<1x128xf32> to vector<16x128xf32>
    %46 = arith.addf %43, %45 : vector<16x128xf32>
    %cst_23 = arith.constant dense<0.000000e+00> : vector<16xf32>
    %47 = vector.multi_reduction <add>, %46, %cst_23 [1] : vector<16x128xf32> to vector<16xf32>
    %48 = vector.shape_cast %47 : vector<16xf32> to vector<16x1xf32>
    %cst_24 = arith.constant 3.125000e-02 : f32
    %49 = vector.broadcast %cst_24 : f32 to vector<16x1xf32>
    %50 = arith.mulf %48, %49 : vector<16x1xf32>
    %51 = arith.mulf %46, %46 : vector<16x128xf32>
    %cst_25 = arith.constant dense<0.000000e+00> : vector<16xf32>
    %52 = vector.multi_reduction <add>, %51, %cst_25 [1] : vector<16x128xf32> to vector<16xf32>
    %53 = vector.shape_cast %52 : vector<16xf32> to vector<16x1xf32>
    %cst_26 = arith.constant 3.125000e-02 : f32
    %54 = vector.broadcast %cst_26 : f32 to vector<16x1xf32>
    %55 = arith.mulf %53, %54 : vector<16x1xf32>
    %56 = arith.mulf %50, %50 : vector<16x1xf32>
    %57 = arith.subf %55, %56 : vector<16x1xf32>
    %cst_27 = arith.constant 0.000000e+00 : f32
    %58 = vector.broadcast %cst_27 : f32 to vector<16x1xf32>
    %59 = arith.maximumf %57, %58 : vector<16x1xf32>
    %60 = vector.broadcast %50 : vector<16x1xf32> to vector<16x128xf32>
    %61 = arith.subf %46, %60 : vector<16x128xf32>
    %cst_28 = arith.constant 9.99999974E-6 : f32
    %62 = vector.broadcast %cst_28 : f32 to vector<16x1xf32>
    %63 = arith.addf %59, %62 : vector<16x1xf32>
    %64 = math.rsqrt %63 : vector<16x1xf32>
    %65 = vector.broadcast %64 : vector<16x1xf32> to vector<16x128xf32>
    %66 = arith.mulf %61, %65 : vector<16x128xf32>
    %c0_29 = arith.constant 0 : index
    %c0_30 = arith.constant 0 : index
    %67 = vector.load %arg8[%c0_29, %c0_30] : memref<1x128xf32, #tpu.memory_space<vmem>>, vector<1x128xf32>
    %68 = vector.broadcast %67 : vector<1x128xf32> to vector<16x128xf32>
    %69 = arith.mulf %66, %68 : vector<16x128xf32>
    %c0_31 = arith.constant 0 : index
    %c0_32 = arith.constant 0 : index
    %70 = vector.load %arg9[%c0_31, %c0_32] : memref<1x128xf32, #tpu.memory_space<vmem>>, vector<1x128xf32>
    %71 = vector.broadcast %70 : vector<1x128xf32> to vector<16x128xf32>
    %72 = arith.addf %69, %71 : vector<16x128xf32>
    %cst_33 = arith.constant 5.000000e-01 : f32
    %73 = vector.broadcast %cst_33 : f32 to vector<16x128xf32>
    %74 = arith.mulf %73, %72 : vector<16x128xf32>
    %cst_34 = arith.constant 0.707106769 : f32
    %75 = vector.broadcast %cst_34 : f32 to vector<16x128xf32>
    %76 = arith.mulf %72, %75 : vector<16x128xf32>
    %77 = math.erf %76 : vector<16x128xf32>
    %cst_35 = arith.constant 1.000000e+00 : f32
    %78 = vector.broadcast %cst_35 : f32 to vector<16x128xf32>
    %79 = arith.addf %78, %77 : vector<16x128xf32>
    %80 = arith.mulf %74, %79 : vector<16x128xf32>
    %81 = arith.truncf %80 : vector<16x128xf32> to vector<16x128xbf16>
    %c0_36 = arith.constant 0 : index
    %c0_37 = arith.constant 0 : index
    %82 = vector.load %arg10[%c0_36, %c0_37] : memref<128x128xbf16, #tpu.memory_space<vmem>>, vector<128x128xbf16>
    %cst_38 = arith.constant dense<0.000000e+00> : vector<16x128xf32>
    %83 = tpu.matmul %81, %82, %cst_38 {dimension_numbers = #tpu.dot_dimension_numbers<[1], [0], [0], [1], [0, 0, 1, 1], [], []>} : vector<16x128xbf16>, vector<128x128xbf16>, vector<16x128xf32> -> vector<16x128xf32>
    %c0_39 = arith.constant 0 : index
    %c0_40 = arith.constant 0 : index
    %84 = vector.load %arg11[%c0_39, %c0_40] : memref<1x128xf32, #tpu.memory_space<vmem>>, vector<1x128xf32>
    %85 = vector.broadcast %84 : vector<1x128xf32> to vector<16x128xf32>
    %86 = arith.addf %83, %85 : vector<16x128xf32>
    %c0_41 = arith.constant 0 : index
    %c0_42 = arith.constant 0 : index
    %87 = vector.load %arg18[%c0_41, %c0_42] : memref<16x128xf32, #tpu.memory_space<vmem>>, vector<16x128xf32>
    tpu.vector_store %arg18[%c0_41, %c0_42], %86 {strides = array<i32>} : memref<16x128xf32, #tpu.memory_space<vmem>>, vector<16x128xf32>,
    %88 = arith.truncf %86 : vector<16x128xf32> to vector<16x128xbf16>
    %c0_43 = arith.constant 0 : index
    %c0_44 = arith.constant 0 : index
    %89 = vector.load %arg12[%c0_43, %c0_44] : memref<128x128xbf16, #tpu.memory_space<vmem>>, vector<128x128xbf16>
    %cst_45 = arith.constant dense<0.000000e+00> : vector<16x128xf32>
    %90 = tpu.matmul %88, %89, %cst_45 {dimension_numbers = #tpu.dot_dimension_numbers<[1], [0], [0], [1], [0, 0, 1, 1], [], []>} : vector<16x128xbf16>, vector<128x128xbf16>, vector<16x128xf32> -> vector<16x128xf32>
    %c0_46 = arith.constant 0 : index
    %c0_47 = arith.constant 0 : index
    %91 = vector.load %arg13[%c0_46, %c0_47] : memref<1x128xf32, #tpu.memory_space<vmem>>, vector<1x128xf32>
    %92 = vector.broadcast %91 : vector<1x128xf32> to vector<16x128xf32>
    %93 = arith.addf %90, %92 : vector<16x128xf32>
    %cst_48 = arith.constant dense<0.000000e+00> : vector<16xf32>
    %94 = vector.multi_reduction <add>, %93, %cst_48 [1] : vector<16x128xf32> to vector<16xf32>
    %95 = vector.shape_cast %94 : vector<16xf32> to vector<16x1xf32>
    %cst_49 = arith.constant 6.250000e-02 : f32
    %96 = vector.broadcast %cst_49 : f32 to vector<16x1xf32>
    %97 = arith.mulf %95, %96 : vector<16x1xf32>
    %98 = arith.mulf %93, %93 : vector<16x128xf32>
    %cst_50 = arith.constant dense<0.000000e+00> : vector<16xf32>
    %99 = vector.multi_reduction <add>, %98, %cst_50 [1] : vector<16x128xf32> to vector<16xf32>
    %100 = vector.shape_cast %99 : vector<16xf32> to vector<16x1xf32>
    %cst_51 = arith.constant 6.250000e-02 : f32
    %101 = vector.broadcast %cst_51 : f32 to vector<16x1xf32>
    %102 = arith.mulf %100, %101 : vector<16x1xf32>
    %103 = arith.mulf %97, %97 : vector<16x1xf32>
    %104 = arith.subf %102, %103 : vector<16x1xf32>
    %cst_52 = arith.constant 0.000000e+00 : f32
    %105 = vector.broadcast %cst_52 : f32 to vector<16x1xf32>
    %106 = arith.maximumf %104, %105 : vector<16x1xf32>
    %107 = vector.broadcast %97 : vector<16x1xf32> to vector<16x128xf32>
    %108 = arith.subf %93, %107 : vector<16x128xf32>
    %cst_53 = arith.constant 9.99999974E-6 : f32
    %109 = vector.broadcast %cst_53 : f32 to vector<16x1xf32>
    %110 = arith.addf %106, %109 : vector<16x1xf32>
    %111 = math.rsqrt %110 : vector<16x1xf32>
    %112 = vector.broadcast %111 : vector<16x1xf32> to vector<16x128xf32>
    %113 = arith.mulf %108, %112 : vector<16x128xf32>
    %c0_54 = arith.constant 0 : index
    %c0_55 = arith.constant 0 : index
    %114 = vector.load %arg14[%c0_54, %c0_55] : memref<1x128xf32, #tpu.memory_space<vmem>>, vector<1x128xf32>
    %115 = vector.broadcast %114 : vector<1x128xf32> to vector<16x128xf32>
    %116 = arith.mulf %113, %115 : vector<16x128xf32>
    %c0_56 = arith.constant 0 : index
    %c0_57 = arith.constant 0 : index
    %117 = vector.load %arg15[%c0_56, %c0_57] : memref<1x128xf32, #tpu.memory_space<vmem>>, vector<1x128xf32>
    %118 = vector.broadcast %117 : vector<1x128xf32> to vector<16x128xf32>
    %119 = arith.addf %116, %118 : vector<16x128xf32>
    %cst_58 = arith.constant 5.000000e-01 : f32
    %120 = vector.broadcast %cst_58 : f32 to vector<16x128xf32>
    %121 = arith.mulf %120, %119 : vector<16x128xf32>
    %cst_59 = arith.constant 0.707106769 : f32
    %122 = vector.broadcast %cst_59 : f32 to vector<16x128xf32>
    %123 = arith.mulf %119, %122 : vector<16x128xf32>
    %124 = math.erf %123 : vector<16x128xf32>
    %cst_60 = arith.constant 1.000000e+00 : f32
    %125 = vector.broadcast %cst_60 : f32 to vector<16x128xf32>
    %126 = arith.addf %125, %124 : vector<16x128xf32>
    %127 = arith.mulf %121, %126 : vector<16x128xf32>
    %128 = arith.truncf %127 : vector<16x128xf32> to vector<16x128xbf16>
    %c0_61 = arith.constant 0 : index
    %c0_62 = arith.constant 0 : index
    %129 = vector.load %arg16[%c0_61, %c0_62] : memref<128x128xbf16, #tpu.memory_space<vmem>>, vector<128x128xbf16>
    %cst_63 = arith.constant dense<0.000000e+00> : vector<16x128xf32>
    %130 = tpu.matmul %128, %129, %cst_63 {dimension_numbers = #tpu.dot_dimension_numbers<[1], [0], [0], [1], [0, 0, 1, 1], [], []>} : vector<16x128xbf16>, vector<128x128xbf16>, vector<16x128xf32> -> vector<16x128xf32>
    %c0_64 = arith.constant 0 : index
    %c0_65 = arith.constant 0 : index
    %131 = vector.load %arg17[%c0_64, %c0_65] : memref<1x128xf32, #tpu.memory_space<vmem>>, vector<1x128xf32>
    %132 = vector.broadcast %131 : vector<1x128xf32> to vector<16x128xf32>
    %133 = arith.addf %130, %132 : vector<16x128xf32>
    %c0_66 = arith.constant 0 : index
    %c0_67 = arith.constant 0 : index
    %134 = vector.load %arg19[%c0_66, %c0_67] : memref<16x128xf32, #tpu.memory_space<vmem>>, vector<16x128xf32>
    tpu.vector_store %arg19[%c0_66, %c0_67], %133 {strides = array<i32>} : memref<16x128xf32, #tpu.memory_space<vmem>>, vector<16x128xf32>,
    return
  }
  func.func @transform_0(%arg0: i32) -> (i32, i32) {
    %c0_i32 = arith.constant 0 : i32
    %c0_i32_0 = arith.constant 0 : i32
    return %arg0, %c0_i32 : i32, i32
  }
  func.func @transform_1(%arg0: i32) -> (i32, i32) {
    %c0_i32 = arith.constant 0 : i32
    %c0_i32_0 = arith.constant 0 : i32
    %c0_i32_1 = arith.constant 0 : i32
    return %c0_i32, %c0_i32_0 : i32, i32
  }
  func.func @transform_2(%arg0: i32) -> (i32, i32) {
    %c0_i32 = arith.constant 0 : i32
    %c0_i32_0 = arith.constant 0 : i32
    %c0_i32_1 = arith.constant 0 : i32
    return %c0_i32, %c0_i32_0 : i32, i32
  }
  func.func @transform_3(%arg0: i32) -> (i32, i32) {
    %c0_i32 = arith.constant 0 : i32
    %c0_i32_0 = arith.constant 0 : i32
    %c0_i32_1 = arith.constant 0 : i32
    return %c0_i32, %c0_i32_0 : i32, i32
  }
  func.func @transform_4(%arg0: i32) -> (i32, i32) {
    %c0_i32 = arith.constant 0 : i32
    %c0_i32_0 = arith.constant 0 : i32
    %c0_i32_1 = arith.constant 0 : i32
    return %c0_i32, %c0_i32_0 : i32, i32
  }
  func.func @transform_5(%arg0: i32) -> (i32, i32) {
    %c0_i32 = arith.constant 0 : i32
    %c0_i32_0 = arith.constant 0 : i32
    %c0_i32_1 = arith.constant 0 : i32
    return %c0_i32, %c0_i32_0 : i32, i32
  }
  func.func @transform_6(%arg0: i32) -> (i32, i32) {
    %c0_i32 = arith.constant 0 : i32
    %c0_i32_0 = arith.constant 0 : i32
    %c0_i32_1 = arith.constant 0 : i32
    return %c0_i32, %c0_i32_0 : i32, i32
  }
  func.func @transform_7(%arg0: i32) -> (i32, i32) {
    %c0_i32 = arith.constant 0 : i32
    %c0_i32_0 = arith.constant 0 : i32
    %c0_i32_1 = arith.constant 0 : i32
    return %c0_i32, %c0_i32_0 : i32, i32
  }
  func.func @transform_8(%arg0: i32) -> (i32, i32) {
    %c0_i32 = arith.constant 0 : i32
    %c0_i32_0 = arith.constant 0 : i32
    %c0_i32_1 = arith.constant 0 : i32
    return %c0_i32, %c0_i32_0 : i32, i32
  }
  func.func @transform_9(%arg0: i32) -> (i32, i32) {
    %c0_i32 = arith.constant 0 : i32
    %c0_i32_0 = arith.constant 0 : i32
    %c0_i32_1 = arith.constant 0 : i32
    return %c0_i32, %c0_i32_0 : i32, i32
  }
  func.func @transform_10(%arg0: i32) -> (i32, i32) {
    %c0_i32 = arith.constant 0 : i32
    %c0_i32_0 = arith.constant 0 : i32
    %c0_i32_1 = arith.constant 0 : i32
    return %c0_i32, %c0_i32_0 : i32, i32
  }
  func.func @transform_11(%arg0: i32) -> (i32, i32) {
    %c0_i32 = arith.constant 0 : i32
    %c0_i32_0 = arith.constant 0 : i32
    %c0_i32_1 = arith.constant 0 : i32
    return %c0_i32, %c0_i32_0 : i32, i32
  }
  func.func @transform_12(%arg0: i32) -> (i32, i32) {
    %c0_i32 = arith.constant 0 : i32
    %c0_i32_0 = arith.constant 0 : i32
    %c0_i32_1 = arith.constant 0 : i32
    return %c0_i32, %c0_i32_0 : i32, i32
  }
  func.func @transform_13(%arg0: i32) -> (i32, i32) {
    %c0_i32 = arith.constant 0 : i32
    %c0_i32_0 = arith.constant 0 : i32
    %c0_i32_1 = arith.constant 0 : i32
    return %c0_i32, %c0_i32_0 : i32, i32
  }
  func.func @transform_14(%arg0: i32) -> (i32, i32) {
    %c0_i32 = arith.constant 0 : i32
    %c0_i32_0 = arith.constant 0 : i32
    %c0_i32_1 = arith.constant 0 : i32
    return %c0_i32, %c0_i32_0 : i32, i32
  }
  func.func @transform_15(%arg0: i32) -> (i32, i32) {
    %c0_i32 = arith.constant 0 : i32
    %c0_i32_0 = arith.constant 0 : i32
    %c0_i32_1 = arith.constant 0 : i32
    return %c0_i32, %c0_i32_0 : i32, i32
  }
  func.func @transform_16(%arg0: i32) -> (i32, i32) {
    %c0_i32 = arith.constant 0 : i32
    %c0_i32_0 = arith.constant 0 : i32
    %c0_i32_1 = arith.constant 0 : i32
    return %c0_i32, %c0_i32_0 : i32, i32
  }
  func.func @transform_17(%arg0: i32) -> (i32, i32) {
    %c0_i32 = arith.constant 0 : i32
    %c0_i32_0 = arith.constant 0 : i32
    return %arg0, %c0_i32 : i32, i32
  }
  func.func @transform_18(%arg0: i32) -> (i32, i32) {
    %c0_i32 = arith.constant 0 : i32
    %c0_i32_0 = arith.constant 0 : i32
    return %arg0, %c0_i32 : i32, i32
  }
}

</mosaic_0001>

<bundles_post_ra>
// kernel: forward.1
= control target key start
LH: loop header
LB: loop body
LE: loop exit
PB: predicated region body
PF: predicated region fallthrough
CT: control target
= control target key end

     0   :  { %s1499_s0 = inlined_call_operand.vmem [shape: f32[16,128], index: 0, kind: input, shape index: {}]   ;;  %s1500_s1 = inlined_call_operand.hbm [shape: bf16[128,128], index: 1, kind: input, shape index: {}]   ;;  %s1501_s2 = inlined_call_operand.vmem [shape: f32[1,128], index: 2, kind: input, shape index: {}]   ;;  %s1502_s3 = inlined_call_operand.vmem [shape: f32[1,128], index: 3, kind: input, shape index: {}]   ;;  %s1503_s4 = inlined_call_operand.vmem [shape: f32[1,128], index: 4, kind: input, shape index: {}]   ;;  %s1504_s5 = inlined_call_operand.hbm [shape: bf16[128,128], index: 5, kind: input, shape index: {}]   ;;  %s1505_s6 = inlined_call_operand.vmem [shape: f32[1,128], index: 6, kind: input, shape index: {}]   ;;  %s1506_s7 = inlined_call_operand.vmem [shape: f32[1,128], index: 7, kind: input, shape index: {}]   ;;  %s1507_s8 = inlined_call_operand.vmem [shape: f32[1,128], index: 8, kind: input, shape index: {}]   ;;  %s1508_s9 = inlined_call_operand.hbm [shape: bf16[128,128], index: 9, kind: input, shape index: {}]   ;;  %s1509_s10 = inlined_call_operand.vmem [shape: f32[1,128], index: 10, kind: input, shape index: {}]   ;;  %s1510_s11 = inlined_call_operand.hbm [shape: bf16[128,128], index: 11, kind: input, shape index: {}]   ;;  %s1511_s12 = inlined_call_operand.vmem [shape: f32[1,128], index: 12, kind: input, shape index: {}]   ;;  %s1512_s13 = inlined_call_operand.vmem [shape: f32[1,128], index: 13, kind: input, shape index: {}]   ;;  %s1513_s14 = inlined_call_operand.vmem [shape: f32[1,128], index: 14, kind: input, shape index: {}]   ;;  %s1514_s15 = inlined_call_operand.hbm [shape: bf16[128,128], index: 15, kind: input, shape index: {}]   ;;  %s1515_s16 = inlined_call_operand.vmem [shape: f32[1,128], index: 16, kind: input, shape index: {}]   ;;  %s1516_s17 = inlined_call_operand.vmem [shape: f32[16,128], index: 17, kind: output, shape index: {0}]   ;;  %s1517_s18 = inlined_call_operand.vmem [shape: f32[16,128], index: 18, kind: output, shape index: {1}]  }
   0x1   :  { %1519 = sst [smem:[#allocation13_spill]] %s1499_s0 }
   0x2   :  { %1520 = sst [smem:[#allocation14_spill]] %s1500_s1 }
   0x3   :  { %1521 = sst [smem:[#allocation15_spill]] %s1501_s2 }
   0x4   :  { %24 = vsyncpa [#allocation3], 0 }
   0x5   :  { %25 = vsyncpa [#allocation5], 0 }
   0x6   :  { %26 = vsyncpa [#allocation8], 0  ;;  %s1252_s27 = smov [#allocation4]   ;;  %s1253_s29 = smov [#allocation7]  }
   0x7   :  { %s52_s28 = sshll.u32 %s1252_s27, 4  ;;  %s84_s30 = sshll.u32 %s1253_s29, 4  ;;  %s53_s28 = int_to_ptr.vmem [resolvable:$true] %s52_s28  ;;  %s85_s30 = int_to_ptr.vmem [resolvable:$true] %s84_s30 }
   0x8   :  { %s1154_s0 = scalar_lea.vmem %s53_s28, 1024  ;;  %p1159_p1 = scmp.lt.s32.totalorder %s53_s28, %s53_s28 }
   0x9   :  { %p1155_p0 = scmp.ne.s32.totalorder %s53_s28, %s1154_s0  ;;  %p1160_p2 = scmp.lt.s32.totalorder %s1154_s0, %s1154_s0 }
   0xb   :  { %p1161_p3 = por %p1160_p2, %p1159_p1 }
   0xd   :  { %p1162_p4 = pnand %p1161_p3, %p1155_p0 }
   0xf   :  { %1165 = shalt.err (!%p1162_p4)
}
  0x10   :  { %s1254_s19 = smov 64   ;;  %s1255_s1 = smov 4  }
  0x11   :  { %58 = dma.hbm_to_vmem [thread:$0]  %s1504_s5, 1024, %s53_s28, [#allocation5], %s1254_s19, %s1254_s19, %s1255_s1  }
  0x12   :  { %s1174_s22 = scalar_lea.vmem %s85_s30, 1024  ;;  %p1179_p6 = scmp.lt.s32.totalorder %s85_s30, %s85_s30 }
  0x13   :  { %p1175_p5 = scmp.ne.s32.totalorder %s85_s30, %s1174_s22  ;;  %p1180_p7 = scmp.lt.s32.totalorder %s1174_s22, %s1174_s22 }
  0x15   :  { %p1181_p8 = por %p1180_p7, %p1179_p6 }
  0x17   :  { %p1182_p9 = pnand %p1181_p8, %p1175_p5 }
  0x19   :  { %1185 = shalt.err (!%p1182_p9)
}
  0x1a   :  { %90 = dma.hbm_to_vmem [thread:$0]  %s1510_s11, 1024, %s85_s30, [#allocation8], %s1254_s19, %s1254_s19, %s1255_s1  }
  0x1b   :  { %s1256_s24 = smov [#allocation2]   ;;  %s1257_s26 = smov [#allocation6]  }
  0x1c   :  { %s34_s25 = sshll.u32 %s1256_s24, 4  ;;  %s70_s27 = sshll.u32 %s1257_s26, 4  ;;  %s35_s25 = int_to_ptr.vmem [resolvable:$true] %s34_s25  ;;  %s71_s27 = int_to_ptr.vmem [resolvable:$true] %s70_s27 }
  0x1d   :  { %s1194_s5 = scalar_lea.vmem %s35_s25, 1024  ;;  %p1199_p11 = scmp.lt.s32.totalorder %s35_s25, %s35_s25 }
  0x1e   :  { %p1195_p10 = scmp.ne.s32.totalorder %s35_s25, %s1194_s5  ;;  %p1200_p12 = scmp.lt.s32.totalorder %s1194_s5, %s1194_s5 }
  0x20   :  { %p1201_p13 = por %p1200_p12, %p1199_p11 }
  0x22   :  { %p1202_p0 = pnand %p1201_p13, %p1195_p10 }
  0x24   :  { %1205 = shalt.err (!%p1202_p0)
}
  0x25   :  { %s1522_s0 = sld [smem:[#allocation14_spill]]  ;;  %s1214_s11 = scalar_lea.vmem %s71_s27, 1024 }
  0x26   :  { %p1215_p1 = scmp.ne.s32.totalorder %s71_s27, %s1214_s11  ;;  %p1219_p2 = scmp.lt.s32.totalorder %s71_s27, %s71_s27 }
  0x27   :  { %p1220_p3 = scmp.lt.s32.totalorder %s1214_s11, %s1214_s11 }
  0x29   :  { %p1221_p4 = por %p1220_p3, %p1219_p2 }
  0x2b   :  { %40 = dma.hbm_to_vmem [thread:$0]  %s1522_s0, 1024, %s35_s25, [#allocation3], %s1254_s19, %s1254_s19, %s1255_s1  }
  0x2c   :  { %p1222_p5 = pnand %p1221_p4, %p1215_p1 }
  0x2e   :  { %1225 = shalt.err (!%p1222_p5)
}
  0x2f   :  { %76 = dma.hbm_to_vmem [thread:$0]  %s1508_s9, 1024, %s71_s27, [#allocation5], %s1254_s19, %s1254_s19, %s1255_s1  }
  0x30   :  { %s1258_s21 = smov [#allocation9]  }
  0x31   :  { %s102_s22 = sshll.u32 %s1258_s21, 4  ;;  %s103_s22 = int_to_ptr.vmem [resolvable:$true] %s102_s22 }
  0x32   :  { %s1234_s2 = scalar_lea.vmem %s103_s22, 1024  ;;  %p1239_p7 = scmp.lt.s32.totalorder %s103_s22, %s103_s22 }
  0x33   :  { %p1235_p6 = scmp.ne.s32.totalorder %s103_s22, %s1234_s2  ;;  %p1240_p8 = scmp.lt.s32.totalorder %s1234_s2, %s1234_s2 }
  0x35   :  { %p1241_p9 = por %p1240_p8, %p1239_p7 }
  0x37   :  { %p1242_p10 = pnand %p1241_p9, %p1235_p6 }
  0x39   :  { %1245 = shalt.err (!%p1242_p10)
}
  0x3a   :  { %108 = dma.hbm_to_vmem [thread:$0]  %s1514_s15, 1024, %s103_s22, [#allocation8], %s1254_s19, %s1254_s19, %s1255_s1  }
  0x3b   :  { %1246 = dma.done.wait [#allocation3], 1024  }
  0x3c   :  { %1247 = vsyncadd [#allocation3], 4294966272 }
  0x3d   :  { %1248 = dma.done.wait [#allocation5], 2048  }
  0x3e   :  { %1249 = vsyncadd [#allocation5], 4294965248 }
  0x3f   :  { %1250 = dma.done.wait [#allocation8], 2048  }
  0x40   :  { %1251 = vsyncadd [#allocation8], 4294965248  ;;  %v1259_v0 = vmov 0.0   ;;  %vm1260_vm0 = vmmov 0   ;;  %v1082_v1 = vld [vmem:[#allocation2 + $0x38] sm:$0xff]   ;;  %v1083_v2 = vld [vmem:[#allocation2 + $0x30] sm:$0xff]  }
  0x41   :  { %973 = vmatprep.subr.bf16.mxu0 %v1259_v0  ;;  %989 = vmatprep.mubr.msk.bf16.mxu0 %vm1260_vm0, %v1259_v0  ;;  %v1084_v3 = vld [vmem:[#allocation2 + $0x28] sm:$0xff]   ;;  %v1085_v4 = vld [vmem:[#allocation2 + $0x20] sm:$0xff]   ;;  %v1086_v5 = vld [vmem:[#allocation2 + $0x18] sm:$0xff]   ;;  %s1523_s19 = sld [smem:[#allocation13_spill]] }
  0x42   :  { %993 = vmatprep.subr.bf16.mxu1 %v1259_v0  ;;  %1009 = vmatprep.mubr.msk.bf16.mxu1 %vm1260_vm0, %v1259_v0  ;;  %v1087_v6 = vld [vmem:[#allocation2 + $0x10] sm:$0xff]   ;;  %v1088_v7 = vld [vmem:[#allocation2 + $0x8] sm:$0xff]   ;;  %v1089_v8 = vld [vmem:[#allocation2] sm:$0xff]   ;;  %s1524_s5 = sld [smem:[#allocation15_spill]] }
  0x43   :  { %974 = vmatpush3.bf16.msra.mxu0 %v1082_v1  ;;  %v1090_v21 = vld [vmem:[#allocation4 + $0x38] sm:$0xff]   ;;  %v1091_v22 = vld [vmem:[#allocation4 + $0x30] sm:$0xff]   ;;  %v1092_v23 = vld [vmem:[#allocation4 + $0x28] sm:$0xff]  }
  0x44   :  { %975 = vmatprep.subr.bf16.mxu0 %v1259_v0  ;;  %994 = vmatpush3.bf16.msra.mxu1 %v1090_v21  ;;  %v1093_v24 = vld [vmem:[#allocation4 + $0x20] sm:$0xff]   ;;  %v1094_v25 = vld [vmem:[#allocation4 + $0x18] sm:$0xff]   ;;  %v1095_v26 = vld [vmem:[#allocation4 + $0x10] sm:$0xff]  }
  0x45   :  { %995 = vmatprep.subr.bf16.mxu1 %v1259_v0  ;;  %v1096_v27 = vld [vmem:[#allocation4 + $0x8] sm:$0xff]   ;;  %v1097_v28 = vld [vmem:[#allocation4] sm:$0xff]  }
  0x46   :  { %v886_v47 = vld [vmem:[%s1502_s3] ss:$0 sm:$0xff] }
  0x47   :  { %976 = vmatpush3.bf16.msra.mxu0 %v1083_v2  ;;  %v127_v9 = vld [vmem:[%s1523_s19] sm:$0xff]  ;;  %v128_v10 = vld [vmem:[%s1523_s19 + $0x8] sm:$0xff] }
  0x48   :  { %977 = vmatprep.subr.bf16.mxu0 %v1259_v0  ;;  %v129_v11 = vpack.c.bf16 %v128_v10, %v127_v9  ;;  %v877_v12 = vld [vmem:[%s1524_s5] ss:$0 sm:$0xff]  ;;  %996 = vmatpush3.bf16.msra.mxu1 %v1091_v22  ;;  %v1106_v22 = vld [vmem:[#allocation7 + $0x38] sm:$0xff]  }
  0x49   :  { %997 = vmatprep.subr.bf16.mxu1 %v1259_v0  ;;  %v887_v49 = vld [vmem:[%s1503_s4] ss:$0 sm:$0xff] }
  0x4a   :  { %v1105_v21 = vld [vmem:[#allocation6] sm:$0xff]  }
  0x4b   :  { %978 = vmatpush3.bf16.msra.mxu0 %v1084_v3 }
  0x4c   :  { %979 = vmatprep.subr.bf16.mxu0 %v1259_v0  ;;  %998 = vmatpush3.bf16.msra.mxu1 %v1092_v23  ;;  %v1107_v23 = vld [vmem:[#allocation7 + $0x30] sm:$0xff]  }
  0x4d   :  { %999 = vmatprep.subr.bf16.mxu1 %v1259_v0 }
  0x4f   :  { %980 = vmatpush3.bf16.msra.mxu0 %v1085_v4 }
  0x50   :  { %981 = vmatprep.subr.bf16.mxu0 %v1259_v0  ;;  %1000 = vmatpush3.bf16.msra.mxu1 %v1093_v24  ;;  %v1108_v24 = vld [vmem:[#allocation7 + $0x28] sm:$0xff]  }
  0x51   :  { %1001 = vmatprep.subr.bf16.mxu1 %v1259_v0 }
  0x53   :  { %982 = vmatpush3.bf16.msra.mxu0 %v1086_v5  ;;  %v888_v5 = vld [vmem:[%s1505_s6] ss:$0 sm:$0xff] }
  0x54   :  { %983 = vmatprep.subr.bf16.mxu0 %v1259_v0  ;;  %1002 = vmatpush3.bf16.msra.mxu1 %v1094_v25  ;;  %v1109_v25 = vld [vmem:[#allocation7 + $0x20] sm:$0xff]  }
  0x55   :  { %1003 = vmatprep.subr.bf16.mxu1 %v1259_v0 }
  0x57   :  { %984 = vmatpush3.bf16.msra.mxu0 %v1087_v6 }
  0x58   :  { %985 = vmatprep.subr.bf16.mxu0 %v1259_v0  ;;  %1004 = vmatpush3.bf16.msra.mxu1 %v1095_v26  ;;  %v1110_v26 = vld [vmem:[#allocation7 + $0x18] sm:$0xff]  }
  0x59   :  { %1005 = vmatprep.subr.bf16.mxu1 %v1259_v0 }
  0x5b   :  { %986 = vmatpush3.bf16.msra.mxu0 %v1088_v7 }
  0x5c   :  { %987 = vmatprep.subr.bf16.mxu0 %v1259_v0  ;;  %1006 = vmatpush3.bf16.msra.mxu1 %v1096_v27  ;;  %v1111_v27 = vld [vmem:[#allocation7 + $0x10] sm:$0xff]  }
  0x5d   :  { %1007 = vmatprep.subr.bf16.mxu1 %v1259_v0 }
  0x5f   :  { %988 = vmatpush3.bf16.msra.mxu0 %v1089_v8 }
  0x60   :  { %1013 = vmatprep.subr.bf16.mxu0 %v1259_v0  ;;  %1008 = vmatpush3.bf16.msra.mxu1 %v1097_v28 }
  0x61   :  { %1033 = vmatprep.subr.bf16.mxu1 %v1259_v0 }
  0x62   :  { %990 = vmatmul.mubr.bf16.vlgmr.msra.gmra.mxu0 %v129_v11 }
  0x63   :  { %1029 = vmatprep.mubr.msk.bf16.mxu0 %vm1260_vm0, %v1259_v0 }
 0x122   :  { %v235_v13 = vpop.f32.mrf.mxu0 }
 0x123   :  { %v236_v14 = vadd.f32 %v877_v12, %v235_v13 }
 0x124   :  { %v991_v15 = vpop.f32.mrf.mxu0 }
 0x125   :  { %242 = vadd.xlane.f32.xlu0 %v236_v14  ;;  %v248_v16 = vmul.f32 %v236_v14, %v236_v14  ;;  %v1099_v15 = vld [vmem:[#allocation6 + $0x30] sm:$0xff]  }
 0x126   :  { %v238_v17 = vpop.f32.mrf.mxu0 }
 0x127   :  { %v239_v18 = vadd.f32 %v877_v12, %v238_v17  ;;  %250 = vadd.xlane.f32.xlu1 %v248_v16  ;;  %v1100_v16 = vld [vmem:[#allocation6 + $0x28] sm:$0xff]   ;;  %v1101_v17 = vld [vmem:[#allocation6 + $0x20] sm:$0xff]  }
 0x128   :  { %v992_v19 = vpop.f32.mrf.mxu0 }
 0x129   :  { %244 = vadd.xlane.f32.xlu0 %v239_v18  ;;  %v249_v20 = vmul.f32 %v239_v18, %v239_v18  ;;  %v1103_v19 = vld [vmem:[#allocation6 + $0x10] sm:$0xff]  }
 0x12b   :  { %252 = vadd.xlane.f32.xlu1 %v249_v20  ;;  %v1104_v20 = vld [vmem:[#allocation6 + $0x8] sm:$0xff]  }
 0x1ae   :  { %v243_v29 = vpop.xlane.xlu0 %242 }
 0x1af   :  { %v246_v30 = vmul.f32 0.03125, %v243_v29 }
 0x1b0   :  { %v251_v31 = vpop.xlane.xlu1 %250 }
 0x1b1   :  { %v256_v32 = vmul.f32 %v246_v30, %v246_v30  ;;  %v254_v33 = vmul.f32 0.03125, %v251_v31  ;;  %v262_v45 = vsub.f32 %v236_v14, %v246_v30  ;;  %v1098_v14 = vld [vmem:[#allocation6 + $0x38] sm:$0xff]  }
 0x1b2   :  { %v245_v34 = vpop.xlane.xlu0 %244  ;;  %1014 = vmatpush3.bf16.msra.mxu0 %v1098_v14  ;;  %v908_v14 = vld [vmem:[%s1511_s12] ss:$0 sm:$0xff] }
 0x1b3   :  { %v258_v35 = vsub.f32 %v254_v33, %v256_v32  ;;  %v247_v36 = vmul.f32 0.03125, %v245_v34  ;;  %1015 = vmatprep.subr.bf16.mxu0 %v1259_v0 }
 0x1b4   :  { %v253_v37 = vpop.xlane.xlu1 %252 }
 0x1b5   :  { %v260_v38 = vmax.f32 %v258_v35, 0.0  ;;  %v257_v39 = vmul.f32 %v247_v36, %v247_v36  ;;  %v255_v40 = vmul.f32 0.03125, %v253_v37  ;;  %v263_v50 = vsub.f32 %v239_v18, %v247_v36  ;;  %v1102_v18 = vld [vmem:[#allocation6 + $0x18] sm:$0xff]  }
 0x1b6   :  { %1016 = vmatpush3.bf16.msra.mxu0 %v1099_v15 }
 0x1b7   :  { %v264_v41 = vadd.f32 1e-05, %v260_v38  ;;  %v259_v42 = vsub.f32 %v255_v40, %v257_v39  ;;  %1017 = vmatprep.subr.bf16.mxu0 %v1259_v0 }
 0x1b9   :  { %1122 = vrsqrt.f32 %v264_v41  ;;  %v261_v43 = vmax.f32 %v259_v42, 0.0 }
 0x1ba   :  { %1018 = vmatpush3.bf16.msra.mxu0 %v1100_v16 }
 0x1bb   :  { %v265_v44 = vadd.f32 1e-05, %v261_v43  ;;  %1019 = vmatprep.subr.bf16.mxu0 %v1259_v0 }
 0x1bd   :  { %1124 = vrsqrt.f32 %v265_v44 }
 0x1be   :  { %1020 = vmatpush3.bf16.msra.mxu0 %v1101_v17 }
 0x1bf   :  { %1021 = vmatprep.subr.bf16.mxu0 %v1259_v0 }
 0x1c2   :  { %1022 = vmatpush3.bf16.msra.mxu0 %v1102_v18 }
 0x1c3   :  { %1023 = vmatprep.subr.bf16.mxu0 %v1259_v0 }
 0x1c6   :  { %v1123_v46 = vpop.eup %1122  ;;  %1024 = vmatpush3.bf16.msra.mxu0 %v1103_v19 }
 0x1c7   :  { %v268_v48 = vmul.f32 %v1123_v46, %v262_v45  ;;  %1025 = vmatprep.subr.bf16.mxu0 %v1259_v0  ;;  %v897_v46 = vld [vmem:[%s1506_s7] ss:$0 sm:$0xff] }
 0x1c9   :  { %v277_v51 = vmul.f32 %v886_v47, %v268_v48  ;;  %v898_v48 = vld [vmem:[%s1507_s8] ss:$0 sm:$0xff] }
 0x1ca   :  { %v1125_v52 = vpop.eup %1124  ;;  %1026 = vmatpush3.bf16.msra.mxu0 %v1104_v20 }
 0x1cb   :  { %v269_v53 = vmul.f32 %v1125_v52, %v263_v50  ;;  %v286_v54 = vadd.f32 %v887_v49, %v277_v51  ;;  %1027 = vmatprep.subr.bf16.mxu0 %v1259_v0 }
 0x1cd   :  { %v278_v55 = vmul.f32 %v886_v47, %v269_v53  ;;  %v290_v56 = vmul.f32 0.70710677, %v286_v54  ;;  %v288_v62 = vmul.f32 0.5, %v286_v54 }
 0x1ce   :  { %1028 = vmatpush3.bf16.msra.mxu0 %v1105_v21 }
 0x1cf   :  { %v287_v57 = vadd.f32 %v887_v49, %v278_v55  ;;  %1126 = verf.f32 %v290_v56  ;;  %1053 = vmatprep.subr.bf16.mxu0 %v1259_v0 }
 0x1d1   :  { %v291_v58 = vmul.f32 0.70710677, %v287_v57  ;;  %v289_v63 = vmul.f32 0.5, %v287_v57 }
 0x1d3   :  { %1128 = verf.f32 %v291_v58 }
 0x1dc   :  { %v1127_v59 = vpop.eup %1126 }
 0x1dd   :  { %v294_v60 = vadd.f32 1.0, %v1127_v59 }
 0x1df   :  { %v296_v2 = vmul.f32 %v294_v60, %v288_v62 }
 0x1e0   :  { %v1129_v61 = vpop.eup %1128 }
 0x1e1   :  { %v295_v1 = vadd.f32 1.0, %v1129_v61 }
 0x1e3   :  { %v297_v3 = vmul.f32 %v295_v1, %v289_v63 }
 0x1e5   :  { %v298_v4 = vpack.c.bf16 %v297_v3, %v296_v2 }
 0x1e7   :  { %1010 = vmatmul.mubr.bf16.vlgmr.msra.gmra.mxu1 %v298_v4  ;;  %v1112_v4 = vld [vmem:[#allocation7 + $0x8] sm:$0xff]  }
 0x1e8   :  { %1049 = vmatprep.mubr.msk.bf16.mxu1 %vm1260_vm0, %v1259_v0  ;;  %1034 = vmatpush3.bf16.msra.mxu1 %v1106_v22 }
 0x1e9   :  { %1035 = vmatprep.subr.bf16.mxu1 %v1259_v0 }
 0x1ec   :  { %1036 = vmatpush3.bf16.msra.mxu1 %v1107_v23  ;;  %v1114_v23 = vld [vmem:[#allocation9 + $0x38] sm:$0xff]  }
 0x1ed   :  { %1037 = vmatprep.subr.bf16.mxu1 %v1259_v0 }
 0x1f0   :  { %1038 = vmatpush3.bf16.msra.mxu1 %v1108_v24  ;;  %v1115_v24 = vld [vmem:[#allocation9 + $0x30] sm:$0xff]  }
 0x1f1   :  { %1039 = vmatprep.subr.bf16.mxu1 %v1259_v0 }
 0x1f4   :  { %1040 = vmatpush3.bf16.msra.mxu1 %v1109_v25  ;;  %v1116_v25 = vld [vmem:[#allocation9 + $0x28] sm:$0xff]  }
 0x1f5   :  { %1041 = vmatprep.subr.bf16.mxu1 %v1259_v0 }
 0x1f8   :  { %1042 = vmatpush3.bf16.msra.mxu1 %v1110_v26  ;;  %v1117_v26 = vld [vmem:[#allocation9 + $0x20] sm:$0xff]  }
 0x1f9   :  { %1043 = vmatprep.subr.bf16.mxu1 %v1259_v0 }
 0x1fc   :  { %1044 = vmatpush3.bf16.msra.mxu1 %v1111_v27  ;;  %v1118_v27 = vld [vmem:[#allocation9 + $0x18] sm:$0xff]  }
 0x1fd   :  { %1045 = vmatprep.subr.bf16.mxu1 %v1259_v0 }
 0x200   :  { %1046 = vmatpush3.bf16.msra.mxu1 %v1112_v4 }
 0x201   :  { %1047 = vmatprep.subr.bf16.mxu1 %v1259_v0 }
 0x2a7   :  { %v404_v6 = vpop.f32.mrf.mxu1 }
 0x2a8   :  { %v1430_v7 = vadd.f32 %v888_v5, %v404_v6  ;;  %v899_v6 = vld [vmem:[%s1509_s10] ss:$0 sm:$0xff] }
 0x2a9   :  { %v1011_v8 = vpop.f32.mrf.mxu1 }
 0x2aa   :  { %411 = vadd.xlane.f32.xlu0 %v1430_v7  ;;  %v417_v11 = vmul.f32 %v1430_v7, %v1430_v7 }
 0x2ab   :  { %v407_v9 = vpop.f32.mrf.mxu1 }
 0x2ac   :  { %v1433_v10 = vadd.f32 %v888_v5, %v407_v9  ;;  %v1113_v5 = vld [vmem:[#allocation7] sm:$0xff]  }
 0x2ad   :  { %v1012_v12 = vpop.f32.mrf.mxu1  ;;  %1048 = vmatpush3.bf16.msra.mxu1 %v1113_v5 }
 0x2ae   :  { %419 = vadd.xlane.f32.xlu0 %v417_v11  ;;  %413 = vadd.xlane.f32.xlu1 %v1433_v10  ;;  %v418_v13 = vmul.f32 %v1433_v10, %v1433_v10 }
 0x2b2   :  { %421 = vadd.xlane.f32.xlu1 %v418_v13 }
 0x333   :  { %v412_v28 = vpop.xlane.xlu0 %411 }
 0x334   :  { %v415_v29 = vmul.f32 0.03125, %v412_v28  ;;  %v1119_v28 = vld [vmem:[#allocation9 + $0x10] sm:$0xff]  }
 0x336   :  { %v425_v32 = vmul.f32 %v415_v29, %v415_v29  ;;  %v431_v44 = vsub.f32 %v1430_v7, %v415_v29  ;;  %v1120_v29 = vld [vmem:[#allocation9 + $0x8] sm:$0xff]  }
 0x337   :  { %v420_v30 = vpop.xlane.xlu0 %419  ;;  %v414_v31 = vpop.xlane.xlu1 %413 }
 0x338   :  { %v423_v33 = vmul.f32 0.03125, %v420_v30  ;;  %v416_v34 = vmul.f32 0.03125, %v414_v31  ;;  %v1121_v30 = vld [vmem:[#allocation9] sm:$0xff]  }
 0x33a   :  { %v427_v35 = vsub.f32 %v423_v33, %v425_v32  ;;  %v426_v38 = vmul.f32 %v416_v34, %v416_v34  ;;  %v432_v49 = vsub.f32 %v1433_v10, %v416_v34 }
 0x33b   :  { %v422_v36 = vpop.xlane.xlu1 %421 }
 0x33c   :  { %v429_v37 = vmax.f32 %v427_v35, 0.0  ;;  %v424_v39 = vmul.f32 0.03125, %v422_v36 }
 0x33e   :  { %v433_v40 = vadd.f32 1e-05, %v429_v37  ;;  %v428_v41 = vsub.f32 %v424_v39, %v426_v38 }
 0x340   :  { %1130 = vrsqrt.f32 %v433_v40  ;;  %v430_v42 = vmax.f32 %v428_v41, 0.0 }
 0x342   :  { %v434_v43 = vadd.f32 1e-05, %v430_v42 }
 0x344   :  { %1132 = vrsqrt.f32 %v434_v43 }
 0x34d   :  { %v1131_v45 = vpop.eup %1130 }
 0x34e   :  { %v437_v47 = vmul.f32 %v1131_v45, %v431_v44 }
 0x350   :  { %v446_v50 = vmul.f32 %v897_v46, %v437_v47 }
 0x351   :  { %v1133_v51 = vpop.eup %1132 }
 0x352   :  { %v438_v52 = vmul.f32 %v1133_v51, %v432_v49  ;;  %v455_v53 = vadd.f32 %v898_v48, %v446_v50  ;;  %v918_v50 = vld [vmem:[%s1513_s14] ss:$0 sm:$0xff] }
 0x354   :  { %v447_v54 = vmul.f32 %v897_v46, %v438_v52  ;;  %v459_v55 = vmul.f32 0.70710677, %v455_v53  ;;  %v457_v61 = vmul.f32 0.5, %v455_v53 }
 0x356   :  { %v456_v56 = vadd.f32 %v898_v48, %v447_v54  ;;  %1134 = verf.f32 %v459_v55  ;;  %v917_v48 = vld [vmem:[%s1512_s13] ss:$0 sm:$0xff] }
 0x358   :  { %v460_v57 = vmul.f32 0.70710677, %v456_v56  ;;  %v458_v62 = vmul.f32 0.5, %v456_v56 }
 0x35a   :  { %1136 = verf.f32 %v460_v57 }
 0x363   :  { %v1135_v58 = vpop.eup %1134 }
 0x364   :  { %v463_v59 = vadd.f32 1.0, %v1135_v58 }
 0x366   :  { %v465_v1 = vmul.f32 %v463_v59, %v457_v61 }
 0x367   :  { %v1137_v60 = vpop.eup %1136 }
 0x368   :  { %v464_v63 = vadd.f32 1.0, %v1137_v60 }
 0x36a   :  { %v466_v2 = vmul.f32 %v464_v63, %v458_v62 }
 0x36c   :  { %v467_v3 = vpack.c.bf16 %v466_v2, %v465_v1 }
 0x36e   :  { %1030 = vmatmul.mubr.bf16.vlgmr.msra.gmra.mxu0 %v467_v3 }
 0x36f   :  { %1069 = vmatprep.mubr.msk.bf16.mxu0 %vm1260_vm0, %v1259_v0  ;;  %1054 = vmatpush3.bf16.msra.mxu0 %v1114_v23 }
 0x370   :  { %1055 = vmatprep.subr.bf16.mxu0 %v1259_v0 }
 0x373   :  { %1056 = vmatpush3.bf16.msra.mxu0 %v1115_v24 }
 0x374   :  { %1057 = vmatprep.subr.bf16.mxu0 %v1259_v0 }
 0x377   :  { %1058 = vmatpush3.bf16.msra.mxu0 %v1116_v25 }
 0x378   :  { %1059 = vmatprep.subr.bf16.mxu0 %v1259_v0 }
 0x37b   :  { %1060 = vmatpush3.bf16.msra.mxu0 %v1117_v26 }
 0x37c   :  { %1061 = vmatprep.subr.bf16.mxu0 %v1259_v0 }
 0x37f   :  { %1062 = vmatpush3.bf16.msra.mxu0 %v1118_v27 }
 0x380   :  { %1063 = vmatprep.subr.bf16.mxu0 %v1259_v0 }
 0x383   :  { %1064 = vmatpush3.bf16.msra.mxu0 %v1119_v28 }
 0x384   :  { %1065 = vmatprep.subr.bf16.mxu0 %v1259_v0 }
 0x387   :  { %1066 = vmatpush3.bf16.msra.mxu0 %v1120_v29 }
 0x388   :  { %1067 = vmatprep.subr.bf16.mxu0 %v1259_v0 }
 0x38b   :  { %1068 = vmatpush3.bf16.msra.mxu0 %v1121_v30 }
 0x42e   :  { %v573_v7 = vpop.f32.mrf.mxu0 }
 0x42f   :  { %v574_v8 = vadd.f32 %v899_v6, %v573_v7 }
 0x430   :  { %v1031_v9 = vpop.f32.mrf.mxu0 }
 0x431   :  { %580 = vst [vmem:[%s1516_s17] sm:$0xff] %v574_v8 }
 0x432   :  { %v576_v10 = vpop.f32.mrf.mxu0 }
 0x433   :  { %v577_v11 = vadd.f32 %v899_v6, %v576_v10  ;;  %v919_v6 = vld [vmem:[%s1515_s16] ss:$0 sm:$0xff] }
 0x434   :  { %v1032_v12 = vpop.f32.mrf.mxu0 }
 0x435   :  { %581 = vst [vmem:[%s1516_s17 + $0x8] sm:$0xff] %v577_v11  ;;  %v582_v13 = vpack.c.bf16 %v577_v11, %v574_v8 }
 0x437   :  { %1050 = vmatmul.mubr.bf16.vlgmr.msra.gmra.mxu1 %v582_v13 }
 0x4f7   :  { %v688_v15 = vpop.f32.mrf.mxu1 }
 0x4f8   :  { %v689_v16 = vadd.f32 %v908_v14, %v688_v15 }
 0x4f9   :  { %v1051_v17 = vpop.f32.mrf.mxu1 }
 0x4fa   :  { %695 = vadd.xlane.f32.xlu0 %v689_v16  ;;  %v701_v20 = vmul.f32 %v689_v16, %v689_v16 }
 0x4fb   :  { %v691_v18 = vpop.f32.mrf.mxu1 }
 0x4fc   :  { %v692_v19 = vadd.f32 %v908_v14, %v691_v18 }
 0x4fd   :  { %v1052_v21 = vpop.f32.mrf.mxu1 }
 0x4fe   :  { %703 = vadd.xlane.f32.xlu0 %v701_v20  ;;  %697 = vadd.xlane.f32.xlu1 %v692_v19  ;;  %v702_v22 = vmul.f32 %v692_v19, %v692_v19 }
 0x502   :  { %705 = vadd.xlane.f32.xlu1 %v702_v22 }
 0x583   :  { %v696_v31 = vpop.xlane.xlu0 %695 }
 0x584   :  { %v699_v32 = vmul.f32 0.0625, %v696_v31 }
 0x586   :  { %v709_v35 = vmul.f32 %v699_v32, %v699_v32  ;;  %v715_v0 = vsub.f32 %v689_v16, %v699_v32 }
 0x587   :  { %v704_v33 = vpop.xlane.xlu0 %703  ;;  %v698_v34 = vpop.xlane.xlu1 %697 }
 0x588   :  { %v707_v36 = vmul.f32 0.0625, %v704_v33  ;;  %v700_v37 = vmul.f32 0.0625, %v698_v34 }
 0x58a   :  { %v711_v38 = vsub.f32 %v707_v36, %v709_v35  ;;  %v710_v41 = vmul.f32 %v700_v37, %v700_v37  ;;  %v716_v51 = vsub.f32 %v692_v19, %v700_v37 }
 0x58b   :  { %v706_v39 = vpop.xlane.xlu1 %705 }
 0x58c   :  { %v713_v40 = vmax.f32 %v711_v38, 0.0  ;;  %v708_v42 = vmul.f32 0.0625, %v706_v39 }
 0x58e   :  { %v717_v43 = vadd.f32 1e-05, %v713_v40  ;;  %v712_v44 = vsub.f32 %v708_v42, %v710_v41 }
 0x590   :  { %1138 = vrsqrt.f32 %v717_v43  ;;  %v714_v45 = vmax.f32 %v712_v44, 0.0 }
 0x592   :  { %v718_v46 = vadd.f32 1e-05, %v714_v45 }
 0x594   :  { %1140 = vrsqrt.f32 %v718_v46 }
 0x59d   :  { %v1139_v47 = vpop.eup %1138 }
 0x59e   :  { %v721_v49 = vmul.f32 %v1139_v47, %v715_v0 }
 0x5a0   :  { %v730_v52 = vmul.f32 %v917_v48, %v721_v49 }
 0x5a1   :  { %v1141_v53 = vpop.eup %1140 }
 0x5a2   :  { %v722_v54 = vmul.f32 %v1141_v53, %v716_v51  ;;  %v739_v55 = vadd.f32 %v918_v50, %v730_v52 }
 0x5a4   :  { %v731_v56 = vmul.f32 %v917_v48, %v722_v54  ;;  %v743_v57 = vmul.f32 0.70710677, %v739_v55  ;;  %v741_v63 = vmul.f32 0.5, %v739_v55 }
 0x5a6   :  { %v740_v58 = vadd.f32 %v918_v50, %v731_v56  ;;  %1142 = verf.f32 %v743_v57 }
 0x5a8   :  { %v744_v59 = vmul.f32 0.70710677, %v740_v58  ;;  %v742_v1 = vmul.f32 0.5, %v740_v58 }
 0x5aa   :  { %1144 = verf.f32 %v744_v59 }
 0x5b3   :  { %v1143_v60 = vpop.eup %1142 }
 0x5b4   :  { %v747_v61 = vadd.f32 1.0, %v1143_v60 }
 0x5b6   :  { %v749_v3 = vmul.f32 %v747_v61, %v741_v63 }
 0x5b7   :  { %v1145_v62 = vpop.eup %1144 }
 0x5b8   :  { %v748_v2 = vadd.f32 1.0, %v1145_v62 }
 0x5ba   :  { %v750_v4 = vmul.f32 %v748_v2, %v742_v1 }
 0x5bc   :  { %v751_v5 = vpack.c.bf16 %v750_v4, %v749_v3 }
 0x5be   :  { %1070 = vmatmul.mubr.bf16.vlgmr.msra.gmra.mxu0 %v751_v5 }
 0x67e   :  { %v857_v7 = vpop.f32.mrf.mxu0 }
 0x67f   :  { %v858_v8 = vadd.f32 %v919_v6, %v857_v7 }
 0x680   :  { %v1071_v9 = vpop.f32.mrf.mxu0 }
 0x681   :  { %864 = vst [vmem:[%s1517_s18] sm:$0xff] %v858_v8 }
 0x682   :  { %v860_v10 = vpop.f32.mrf.mxu0 }
 0x683   :  { %v861_v11 = vadd.f32 %v919_v6, %v860_v10 }
 0x684   :  { %v1072_v12 = vpop.f32.mrf.mxu0 }
 0x685   :  { %865 = vst [vmem:[%s1517_s18 + $0x8] sm:$0xff] %v861_v11 }
 0x686   :  { %874 = vsyncpa [#allocation3], 1 }
 0x687   :  { %875 = vsyncpa [#allocation5], 1 }
 0x688   :  { %876 = vsyncpa [#allocation8], 1 }

</bundles_post_ra>
